<compile_context>
chip_gen: v7x
topology: tpu7x:2x2x1
jax: 0.10.0
libtpu: 0.0.40
codegen_flags: <defaults>
</compile_context>

<pallas_src>
import math

import jax
import jax.numpy as jnp
from jax.experimental import pallas as pl
from jax.experimental.pallas import tpu as pltpu


def _round_up(n, m):
    return ((n + m - 1) // m) * m


def make_position_encoding_table(input_dim, max_len=5000, *, dtype=jnp.float32):
    """Init-time sinusoidal table (register_buffer equivalent), padded to a multiple of 8 rows."""
    assert input_dim % 2 == 0, "input_dim must be even (as the PyTorch module requires)"
    position = jnp.arange(0.0, max_len, dtype=jnp.float32)[:, None]
    div_term = jnp.exp(
        jnp.arange(0.0, input_dim, 2, dtype=jnp.float32)
        * -(math.log(10000.0) / input_dim))
    angles = position * div_term                      # (max_len, input_dim // 2)
    pe = jnp.zeros((max_len, input_dim), jnp.float32)
    pe = pe.at[:, 0::2].set(jnp.sin(angles))
    pe = pe.at[:, 1::2].set(jnp.cos(angles))
    max_len_pad = _round_up(max_len, 8)               # sublane alignment only
    if max_len_pad != max_len:
        pe = jnp.pad(pe, ((0, max_len_pad - max_len), (0, 0)))
    return pe.astype(dtype)


def _dma_slice_kernel(pe_hbm, out_hbm, sem):
    # forward() is a pure row slice: one HBM->HBM DMA, no VMEM round-trip.
    rows = out_hbm.shape[0]
    cp = pltpu.make_async_copy(pe_hbm.at[pl.ds(0, rows), :], out_hbm, sem)
    cp.start()
    cp.wait()


def _tiled_copy_kernel(pe_ref, o_ref):
    # Long-sequence path: lane-dense tile copy through VMEM (parallel grid).
    o_ref[...] = pe_ref[...]


def position_encoder_forward(pos_encoding, x, *, row_tile=1024, dma_threshold_rows=2048):
    """Pallas forward: returns pos_encoding[:x.shape[1]] with shape (1, seq, input_dim)."""
    seq = x.shape[1]
    table_rows, d = pos_encoding.shape
    rows = _round_up(seq, 8)                          # at most 7 extra rows
    assert rows <= table_rows, "sequence longer than max_len"

    if rows <= dma_threshold_rows:
        # Single HBM->HBM DMA; no grid, no VMEM staging.
        out = pl.pallas_call(
            _dma_slice_kernel,
            out_shape=jax.ShapeDtypeStruct((rows, d), pos_encoding.dtype),
            in_specs=[pl.BlockSpec(memory_space=pl.ANY)],
            out_specs=pl.BlockSpec(memory_space=pl.ANY),
            scratch_shapes=[pltpu.SemaphoreType.DMA(())],
        )(pos_encoding)
    else:
        # Tiled copy; row axis marked "parallel" so it shards across v7x's 2 TCs.
        tm = min(row_tile, rows)                      # rows % 8 == 0 -> tm % 8 == 0
        grid = pl.cdiv(rows, tm)
        out = pl.pallas_call(
            _tiled_copy_kernel,
            out_shape=jax.ShapeDtypeStruct((rows, d), pos_encoding.dtype),
            grid=(grid,),
            in_specs=[pl.BlockSpec((tm, d), lambda i: (i, 0))],
            out_specs=pl.BlockSpec((tm, d), lambda i: (i, 0)),
            compiler_params=pltpu.CompilerParams(
                dimension_semantics=("parallel",)),
        )(pos_encoding)

    if rows != seq:
        out = out[:seq]                               # <= 7 rows trimmed
    return out[None]                                  # (1, seq, input_dim)


if __name__ == "__main__":
    key = jax.random.PRNGKey(0)

    input_dim, max_len = 128, 5000
    pos_encoding = make_position_encoding_table(input_dim, max_len)

    def reference(seq):
        position = jnp.arange(0.0, seq, dtype=jnp.float32)[:, None]
        div_term = jnp.exp(jnp.arange(0.0, input_dim, 2, dtype=jnp.float32)
                           * -(math.log(10000.0) / input_dim))
        ref = jnp.zeros((seq, input_dim), jnp.float32)
        ref = ref.at[:, 0::2].set(jnp.sin(position * div_term))
        ref = ref.at[:, 1::2].set(jnp.cos(position * div_term))
        return ref

    # --- Path 1: single HBM->HBM DMA (typical seq) ---------------------------
    batch, seq = 2, 600
    # forward() never reads x's values; only its sequence length matters.
    x = jax.random.normal(key, (batch, seq, input_dim), jnp.float32)
    out = jax.block_until_ready(position_encoder_forward(pos_encoding, x))
    assert out.shape == (1, seq, input_dim)
    assert bool(jnp.array_equal(out[0], pos_encoding[:seq])), "DMA path is not an exact slice"
    assert jnp.allclose(out[0], reference(seq), atol=1e-5, rtol=1e-5), "DMA path mismatch vs ref"

    # --- Path 2: tiled parallel-grid copy (long seq) --------------------------
    seq_long = 3000
    x_long = jnp.zeros((1, seq_long, input_dim), jnp.float32)
    out_long = jax.block_until_ready(position_encoder_forward(pos_encoding, x_long))
    assert out_long.shape == (1, seq_long, input_dim)
    assert bool(jnp.array_equal(out_long[0], pos_encoding[:seq_long])), "tiled path is not an exact slice"
    assert jnp.allclose(out_long[0], reference(seq_long), atol=1e-5, rtol=1e-5), "tiled path mismatch vs ref"

    print("KERNEL_OK")
</pallas_src>

<mosaic_0001>
module attributes {stable_mosaic.version = 11 : i64} {
  func.func @_dma_slice_kernel(%arg0: memref<5000x128xf32, #tpu.memory_space<any>>, %arg1: memref<600x128xf32, #tpu.memory_space<any>>, %arg2: memref<!tpu.dma_semaphore, #tpu.memory_space<semaphore_mem>>) attributes {dimension_semantics = [], scalar_prefetch = 0 : i64, scratch_operands = 1 : i64, tpu.core_type = #tpu.core_type<tc>} {
    %c0_i32 = arith.constant 0 : i32
    %c0_i32_0 = arith.constant 0 : i32
    %0 = tpu.memref_slice %arg0[%c0_i32, %c0_i32_0] : memref<5000x128xf32, #tpu.memory_space<any>> -> memref<600x128xf32, #tpu.memory_space<any>>
    tpu.enqueue_dma source(%0 : memref<600x128xf32, #tpu.memory_space<any>>) target(%arg1 : memref<600x128xf32, #tpu.memory_space<any>>) target_semaphore(%arg2 : memref<!tpu.dma_semaphore, #tpu.memory_space<semaphore_mem>>)
    %c0_i32_1 = arith.constant 0 : i32
    %c0_i32_2 = arith.constant 0 : i32
    %1 = tpu.memref_slice %arg0[%c0_i32_1, %c0_i32_2] : memref<5000x128xf32, #tpu.memory_space<any>> -> memref<600x128xf32, #tpu.memory_space<any>>
    tpu.wait_dma2 semaphore(%arg2 : memref<!tpu.dma_semaphore, #tpu.memory_space<semaphore_mem>>) src(%1 : memref<600x128xf32, #tpu.memory_space<any>>) dst(%arg1 : memref<600x128xf32, #tpu.memory_space<any>>)
    return
  }
}

</mosaic_0001>

<bundles_post_ra>
// kernel: tpu_custom_call.1
= control target key start
LH: loop header
LB: loop body
LE: loop exit
PB: predicated region body
PF: predicated region fallthrough
CT: control target
= control target key end

     0   :  { %s34_s6 = smov [#allocation2]   ;;  %s35_s7 = smov [#allocation3]   ;;  %s53_s0 = inlined_call_operand.hbm [shape: f32[5000,128], index: 0, kind: input, shape index: {}]   ;;  %s54_s1 = inlined_call_operand.hbm [shape: f32[600,128], index: 1, kind: output, shape index: {}]  }
   0x1   :  { %s36_s8 = smov 0  }
   0x2   :  { %18 = dma.general %s53_s0, 9600, %s54_s1, %s34_s6, %s35_s7, [#allocation4], %s36_s8, 0  }
   0x3   :  { %32 = dma.done.wait [#allocation2], 9600 }
   0x4   :  { %33 = vsyncadd [#allocation2], 4294957696 }
   0x5   :  { %22 = vsyncmov [#allocation2] }
   0x8   :  { %s23_s13 = vpop.sfrf %22 }
   0x9   :  { %p28_p0 = scmp.ne.s32.totalorder %s23_s13, 0 }
   0xb   :  { %27 = shalt.err (%p28_p0)  }

</bundles_post_ra>
